<compile_context>
chip_gen: v5e
topology: v5e:2x2
jax: 0.10.0
libtpu: 0.0.40
codegen_flags: <defaults>
</compile_context>

<pallas_src>
import jax
import jax.numpy as jnp
from jax.experimental import pallas as pl
from jax.experimental.pallas import tpu as pltpu

_LANE = 128


def _logistic_kernel(w_ref, b_ref, x_ref, o_ref):
    """One batch tile.

    w_ref: VMEM (in_lanes, out_lanes) weight/de-interleave matrix (resident).
    b_ref: VMEM (1, out_lanes) lane-tiled bias (resident).
    x_ref: VMEM (tile_rows, in_lanes) lane-dense slab of the flat row-major x.
    o_ref: VMEM (tile_rows, out_lanes) sigmoid outputs, contiguous in sample order.
    """
    x = x_ref[...].astype(jnp.float32)
    # One MXU matmul does both the (w0, w1) weighting and the de-interleave of
    # the feature pairs on the lane axis. HIGHEST precision => fp32 contract
    # (default TPU precision would round operands to bf16).
    logits = jnp.dot(
        x,
        w_ref[...],
        preferred_element_type=jnp.float32,
        precision=jax.lax.Precision.HIGHEST,
    )
    logits = logits + b_ref[...]                       # broadcast (1, L) over rows
    # sigmoid lowers to the EUP — off the critical path of this memory-bound kernel.
    o_ref[...] = jax.nn.sigmoid(logits).astype(o_ref.dtype)


def logistic_regression_forward(x, weight, bias, *, in_lanes=256,
                                max_tile_rows=4096, core_parallel=False):
    """x: (B, input_size), weight: (num_class, input_size), bias: (num_class,)."""
    B, in_dim = x.shape
    num_class, in_dim_w = weight.shape
    assert in_dim == in_dim_w and bias.shape == (num_class,)
    assert in_lanes % in_dim == 0 and in_lanes % _LANE == 0
    assert max_tile_rows % 8 == 0

    spr = in_lanes // in_dim              # samples per lane-row (128 for in_dim=2)
    out_lanes = spr * num_class           # 128 for num_class=1 -> dense stores

    # ---- Transpose-free, lane-dense input view ------------------------------
    # The flat row-major buffer of (B, in_dim) already has each sample's
    # features adjacent on the lane axis; these reshapes are bitcasts (no HBM
    # pass). A pad is only needed when B % spr != 0 (never for the usual
    # power-of-two / multiple-of-128 batches).
    flat = x.reshape(-1)
    n_flat = B * in_dim
    pad = (-n_flat) % in_lanes
    if pad:
        flat = jnp.pad(flat, (0, pad))
    n_rows = (n_flat + pad) // in_lanes
    x_dense = flat.reshape(n_rows, in_lanes)

    # ---- Fold weight + de-interleave into one (in_lanes, out_lanes) matrix --
    # w_sel[j*in_dim + k, j*num_class + c] = weight[c, k], so
    # (x_row @ w_sel)[j*num_class + c] = sum_k x[sample j, k] * weight[c, k].
    w32 = weight.astype(jnp.float32)
    w_sel = jnp.einsum("jJ,ck->jkJc", jnp.eye(spr, dtype=jnp.float32), w32)
    w_sel = w_sel.reshape(in_lanes, out_lanes)
    b_row = jnp.tile(bias.astype(jnp.float32), spr).reshape(1, out_lanes)

    # ---- Tiling --------------------------------------------------------------
    # tile_rows is either a multiple of 8 (max_tile_rows) or equals n_rows, so
    # the BlockSpec (8,128) rule always holds; the ragged tail block (if any)
    # is masked by Pallas (OOB input rows only feed OOB, never-written outputs).
    tile_rows = n_rows if n_rows <= max_tile_rows else max_tile_rows
    grid = (pl.cdiv(n_rows, tile_rows),)

    # "parallel" everywhere; pltpu.CORE_PARALLEL splits the batch axis across
    # the two v7x TensorCores (no effect on single-TC v5e/v6e).
    sem = pltpu.CORE_PARALLEL if core_parallel else "parallel"

    itemsize = jnp.dtype(x.dtype).itemsize
    cost = pl.CostEstimate(
        flops=2 * n_rows * in_lanes * out_lanes,
        transcendentals=n_rows * out_lanes,
        bytes_accessed=(n_rows * in_lanes * itemsize
                        + n_rows * out_lanes * itemsize
                        + w_sel.size * 4 + b_row.size * 4),
    )

    out_dense = pl.pallas_call(
        _logistic_kernel,
        out_shape=jax.ShapeDtypeStruct((n_rows, out_lanes), x.dtype),
        grid_spec=pltpu.PrefetchScalarGridSpec(
            num_scalar_prefetch=0,
            grid=grid,
            in_specs=[
                pl.BlockSpec((in_lanes, out_lanes), lambda i: (0, 0)),   # w_sel (resident)
                pl.BlockSpec((1, out_lanes), lambda i: (0, 0)),          # bias row (resident)
                pl.BlockSpec((tile_rows, in_lanes), lambda i: (i, 0)),   # x slab
            ],
            out_specs=pl.BlockSpec((tile_rows, out_lanes), lambda i: (i, 0)),
        ),
        compiler_params=pltpu.CompilerParams(
            dimension_semantics=(sem,),
            vmem_limit_bytes=32 * 1024 * 1024,   # safe on v5e/v6e (128 MiB) and v7x (64 MiB)
        ),
        cost_estimate=cost,
    )(w_sel, b_row, x_dense)

    # Output is already contiguous in sample order: drop padding (if any) and
    # reshape — free when B % spr == 0.
    out_flat = out_dense.reshape(-1)[: B * num_class]
    return out_flat.reshape(B, num_class)


if __name__ == "__main__":
    input_size = 2
    num_class = 1
    batch = 8

    key = jax.random.PRNGKey(0)
    kx, kw, kx2 = jax.random.split(key, 3)

    # Deterministic parameter init (xavier-uniform-like weight, zero bias),
    # mirroring LogisticRegression.initialize().
    limit = (6.0 / (input_size + num_class)) ** 0.5
    weight = jax.random.uniform(
        kw, (num_class, input_size), dtype=jnp.float32, minval=-limit, maxval=limit
    )
    bias = jnp.zeros((num_class,), dtype=jnp.float32)

    def reference(xv):
        logits = jnp.dot(xv, weight.T, precision=jax.lax.Precision.HIGHEST) + bias
        return jax.nn.sigmoid(logits)

    # Small-batch check (single tile, padded flat buffer).
    x = jax.random.normal(kx, (batch, input_size), dtype=jnp.float32)
    out = jax.block_until_ready(logistic_regression_forward(x, weight, bias))
    assert out.shape == (batch, num_class)
    assert jnp.allclose(out, reference(x), atol=1e-6, rtol=1e-5)

    # Multi-tile check: forces a 2-step grid with a ragged, masked last block
    # and a non-multiple-of-128 batch (exercises the pad + tail paths).
    batch2 = 1100
    x2 = jax.random.normal(kx2, (batch2, input_size), dtype=jnp.float32)
    out2 = jax.block_until_ready(
        logistic_regression_forward(x2, weight, bias, max_tile_rows=8)
    )
    assert out2.shape == (batch2, num_class)
    assert jnp.allclose(out2, reference(x2), atol=1e-6, rtol=1e-5)

    print("KERNEL_OK")
</pallas_src>

<mosaic_0001>
module attributes {stable_mosaic.version = 11 : i64} {
  func.func @_logistic_kernel(%arg0: i32, %arg1: memref<256x128xf32, #tpu.memory_space<vmem>>, %arg2: memref<1x128xf32, #tpu.memory_space<vmem>>, %arg3: memref<1x256xf32, #tpu.memory_space<vmem>>, %arg4: memref<1x128xf32, #tpu.memory_space<vmem>>) attributes {dimension_semantics = [#tpu.dimension_semantics<parallel>], iteration_bounds = array<i64: 1>, scalar_prefetch = 0 : i64, scratch_operands = 0 : i64, tpu.core_type = #tpu.core_type<tc>, window_params = [{pipeline_mode = #tpu.pipeline_mode<synchronous>, transform_indices = @transform_0, window_bounds = array<i64: 256, 128>}, {pipeline_mode = #tpu.pipeline_mode<synchronous>, transform_indices = @transform_1, window_bounds = array<i64: 1, 128>}, {transform_indices = @transform_2, window_bounds = array<i64: 1, 256>}, {transform_indices = @transform_3, window_bounds = array<i64: 1, 128>}]} {
    %c0 = arith.constant 0 : index
    %c0_0 = arith.constant 0 : index
    %0 = vector.load %arg3[%c0, %c0_0] : memref<1x256xf32, #tpu.memory_space<vmem>>, vector<1x256xf32>
    %c0_1 = arith.constant 0 : index
    %c0_2 = arith.constant 0 : index
    %1 = vector.load %arg1[%c0_1, %c0_2] : memref<256x128xf32, #tpu.memory_space<vmem>>, vector<256x128xf32>
    %cst = arith.constant dense<0.000000e+00> : vector<1x128xf32>
    %2 = tpu.matmul %0, %1, %cst {dimension_numbers = #tpu.dot_dimension_numbers<[1], [0], [0], [1], [0, 0, 1, 1], [], []>, precision = #tpu.contract_precision<fp32>} : vector<1x256xf32>, vector<256x128xf32>, vector<1x128xf32> -> vector<1x128xf32>
    %c0_3 = arith.constant 0 : index
    %c0_4 = arith.constant 0 : index
    %3 = vector.load %arg2[%c0_3, %c0_4] : memref<1x128xf32, #tpu.memory_space<vmem>>, vector<1x128xf32>
    %4 = arith.addf %2, %3 : vector<1x128xf32>
    %5 = arith.negf %4 : vector<1x128xf32>
    %6 = math.exp %5 : vector<1x128xf32>
    %cst_5 = arith.constant 1.000000e+00 : f32
    %7 = vector.broadcast %cst_5 : f32 to vector<1x128xf32>
    %8 = arith.addf %7, %6 : vector<1x128xf32>
    %9 = arith.divf %7, %8 : vector<1x128xf32>
    %c0_6 = arith.constant 0 : index
    %c0_7 = arith.constant 0 : index
    %10 = vector.load %arg4[%c0_6, %c0_7] : memref<1x128xf32, #tpu.memory_space<vmem>>, vector<1x128xf32>
    tpu.vector_store %arg4[%c0_6, %c0_7], %9 {strides = array<i32>} : memref<1x128xf32, #tpu.memory_space<vmem>>, vector<1x128xf32>,
    return
  }
  func.func @transform_0(%arg0: i32) -> (i32, i32) {
    %c0_i32 = arith.constant 0 : i32
    %c0_i32_0 = arith.constant 0 : i32
    %c0_i32_1 = arith.constant 0 : i32
    return %c0_i32, %c0_i32_0 : i32, i32
  }
  func.func @transform_1(%arg0: i32) -> (i32, i32) {
    %c0_i32 = arith.constant 0 : i32
    %c0_i32_0 = arith.constant 0 : i32
    %c0_i32_1 = arith.constant 0 : i32
    return %c0_i32, %c0_i32_0 : i32, i32
  }
  func.func @transform_2(%arg0: i32) -> (i32, i32) {
    %c0_i32 = arith.constant 0 : i32
    %c0_i32_0 = arith.constant 0 : i32
    return %arg0, %c0_i32 : i32, i32
  }
  func.func @transform_3(%arg0: i32) -> (i32, i32) {
    %c0_i32 = arith.constant 0 : i32
    %c0_i32_0 = arith.constant 0 : i32
    return %arg0, %c0_i32 : i32, i32
  }
}

</mosaic_0001>

<bundles_post_ra>
// kernel: tpu_custom_call.1
= control target key start
LH: loop header
LB: loop body
LE: loop exit
PB: predicated region body
PF: predicated region fallthrough
CT: control target
= control target key end

     0   :  { %8 = vsyncpa [#allocation3], 0  ;;  %s1478_s0 = inlined_call_operand.hbm [shape: f32[256,128], index: 0, kind: input, shape index: {}]   ;;  %s1479_s1 = inlined_call_operand.hbm [shape: f32[1,128], index: 1, kind: input, shape index: {}]   ;;  %s1480_s2 = inlined_call_operand.hbm [shape: f32[1,256], index: 2, kind: input, shape index: {}]   ;;  %s1481_s3 = inlined_call_operand.hbm [shape: f32[1,128], index: 3, kind: output, shape index: {}]  }
   0x1   :  { %9 = vsyncpa [#allocation6], 0  ;;  %s29_s14 = sshll.u32 %s1479_s1, 4  ;;  %s30_s14 = int_to_ptr.hbm [resolvable:$true] %s29_s14 }
   0x2   :  { %10 = vsyncpa [#allocation4], 0  ;;  %s930_s15 = smov [#allocation5]   ;;  %s15_s19 = sshll.u32 %s1478_s0, 4  ;;  %s16_s19 = int_to_ptr.hbm [resolvable:$true] %s15_s19 }
   0x3   :  { %s31_s16 = sshll.u32 %s930_s15, 4  ;;  %s931_s20 = smov [#allocation2]   ;;  %s32_s16 = int_to_ptr.vmem [resolvable:$true] %s31_s16 }
   0x4   :  { %34 = dma.hbm_to_vmem [thread:$0]  %s30_s14, 16, %s32_s16, [#allocation6]  }
   0x5   :  { %s17_s21 = sshll.u32 %s931_s20, 4  ;;  %s932_s22 = smov 128   ;;  %s18_s21 = int_to_ptr.vmem [resolvable:$true] %s17_s21 }
   0x6   :  { %s933_s23 = smov 8   ;;  %s40_s1 = sshll.u32 %s1480_s2, 4  ;;  %s41_s1 = int_to_ptr.hbm [resolvable:$true] %s40_s1 }
   0x7   :  { %23 = dma.hbm_to_vmem [thread:$0]  %s16_s19, 4096, %s18_s21, [#allocation3], %s932_s22, %s932_s22, %s933_s23  }
   0x8   :  { %s934_s26 = smov [#allocation7]  }
   0x9   :  { %s42_s27 = sshll.u32 %s934_s26, 4  ;;  %s43_s27 = int_to_ptr.vmem [resolvable:$true] %s42_s27 }
   0xa   :  { %45 = dma.hbm_to_vmem [thread:$0]  %s41_s1, 32, %s43_s27, [#allocation6]  }
   0xb   :  { %924 = dma.done.wait [#allocation3], 4096  }
   0xc   :  { %925 = vsyncadd [#allocation3], 4294963200 }
   0xd   :  { %926 = dma.done.wait [#allocation6], 48  }
   0xe   :  { %927 = vsyncadd [#allocation6], 4294967248  ;;  %v74_v0 = vld [vmem:[#allocation2 + $0x78] sm:$0xff]  ;;  %v73_v1 = vld [vmem:[#allocation2 + $0x70] sm:$0xff]  ;;  %s935_s0 = smov [#allocation8]   ;;  %s806_s30 = sshll.u32 %s1481_s3, 4  ;;  %s807_s30 = int_to_ptr.hbm [resolvable:$true] %s806_s30 }
   0xf   :  { %v72_v2 = vld [vmem:[#allocation2 + $0x68] sm:$0xff]  ;;  %v965_v3 = vand.u32 4294901760, %v74_v0  ;;  %v967_v4 = vand.u32 4294901760, %v73_v1  ;;  %v71_v6 = vld [vmem:[#allocation2 + $0x60] sm:$0xff]  ;;  %v70_v7 = vld [vmem:[#allocation2 + $0x58] sm:$0xff]  ;;  %s804_s2 = sshll.u32 %s935_s0, 4  ;;  %s805_s2 = int_to_ptr.vmem [resolvable:$true] %s804_s2 }
  0x10   :  { %v969_v5 = vand.u32 4294901760, %v72_v2  ;;  %v69_v8 = vld [vmem:[#allocation2 + $0x50] sm:$0xff]  ;;  %v971_v9 = vand.u32 4294901760, %v71_v6  ;;  %v973_v10 = vand.u32 4294901760, %v70_v7  ;;  %v68_v12 = vld [vmem:[#allocation2 + $0x48] sm:$0xff]  ;;  %v67_v13 = vld [vmem:[#allocation2 + $0x40] sm:$0xff] }
  0x11   :  { %v975_v11 = vand.u32 4294901760, %v69_v8  ;;  %98 = vmatpush.msra.mxu0 %v965_v3  ;;  %v979_v14 = vsub.f32 %v74_v0, %v965_v3  ;;  %v982_v15 = vsub.f32 %v73_v1, %v967_v4  ;;  %294 = vmatpush.msra.mxu3 %v965_v3  ;;  %v988_v17 = vand.u32 4294901760, %v68_v12  ;;  %v66_v21 = vld [vmem:[#allocation2 + $0x38] sm:$0xff]  ;;  %v65_v26 = vld [vmem:[#allocation2 + $0x30] sm:$0xff]  ;;  %v64_v36 = vld [vmem:[#allocation2 + $0x28] sm:$0xff] }
  0x12   :  { %v986_v16 = vsub.f32 %v72_v2, %v969_v5  ;;  %v991_v18 = vsub.f32 %v71_v6, %v971_v9  ;;  %v994_v19 = vsub.f32 %v70_v7, %v973_v10  ;;  %v996_v20 = vand.u32 4294901760, %v67_v13  ;;  %v63_v42 = vld [vmem:[#allocation2 + $0x20] sm:$0xff]  ;;  %v62_v47 = vld [vmem:[#allocation2 + $0x18] sm:$0xff]  ;;  %v61_v54 = vld [vmem:[#allocation2 + $0x10] sm:$0xff] }
  0x13   :  { %100 = vmatpush.msra.mxu0 %v967_v4  ;;  %241 = vmatpush.msra.mxu2 %v979_v14  ;;  %v140_v22 = vand.u32 4294901760, %v979_v14  ;;  %v1497_v23 = vand.u32 4294901760, %v982_v15  ;;  %v1004_v25 = vsub.f32 %v69_v8, %v975_v11  ;;  %v1010_v29 = vsub.f32 %v68_v12, %v988_v17  ;;  %v90_v59 = vld [vmem:[#allocation2 + $0xf8] sm:$0xff]  ;;  %v60_v61 = vld [vmem:[#allocation2 + $0x8] sm:$0xff]  ;;  %v89_v2 = vld [vmem:[#allocation2 + $0xf0] sm:$0xff] }
  0x14   :  { %v1495_v24 = vand.u32 4294901760, %v986_v16  ;;  %296 = vmatpush.msra.mxu3 %v967_v4  ;;  %v1493_v27 = vand.u32 4294901760, %v991_v18  ;;  %v1491_v28 = vand.u32 4294901760, %v994_v19  ;;  %v1023_v33 = vand.u32 4294901760, %v66_v21  ;;  %v59_v7 = vld [vmem:[#allocation2] sm:$0xff] }
  0x15   :  { %102 = vmatpush.msra.mxu0 %v969_v5  ;;  %244 = vmatpush.msra.mxu2 %v982_v15  ;;  %v141_v30 = vsub.f32 %v979_v14, %v140_v22  ;;  %v147_v31 = vsub.f32 %v982_v15, %v1497_v23  ;;  %v1026_v34 = vand.u32 4294901760, %v65_v26  ;;  %v1029_v35 = vsub.f32 %v67_v13, %v996_v20  ;;  %v81_v23 = vld [vmem:[#allocation2 + $0xb0] sm:$0xff] }
  0x16   :  { %v153_v32 = vsub.f32 %v986_v16, %v1495_v24  ;;  %298 = vmatpush.msra.mxu3 %v969_v5  ;;  %v159_v39 = vsub.f32 %v991_v18, %v1493_v27  ;;  %v1489_v40 = vand.u32 4294901760, %v1004_v25  ;;  %v165_v41 = vsub.f32 %v994_v19, %v1491_v28 }
  0x17   :  { %104 = vmatpush.msra.mxu0 %v971_v9  ;;  %v142_v37 = vand.u32 4294901760, %v141_v30  ;;  %247 = vmatpush.msra.mxu2 %v986_v16  ;;  %v148_v38 = vand.u32 4294901760, %v147_v31  ;;  %v1042_v44 = vand.u32 4294901760, %v64_v36  ;;  %v1488_v45 = vand.u32 4294901760, %v1010_v29 }
  0x18   :  { %300 = vmatpush.msra.mxu3 %v971_v9  ;;  %v154_v43 = vand.u32 4294901760, %v153_v32  ;;  %v1046_v46 = vsub.f32 %v66_v21, %v1023_v33  ;;  %v1487_v48 = vand.u32 4294901760, %v1029_v35  ;;  %v160_v49 = vand.u32 4294901760, %v159_v39  ;;  %v88_v32 = vld [vmem:[#allocation2 + $0xe8] sm:$0xff] }
  0x19   :  { %106 = vmatpush.msra.mxu0 %v973_v10  ;;  %143 = vmatpush.msra.mxu1 %v142_v37  ;;  %v171_v50 = vsub.f32 %v1004_v25, %v1489_v40  ;;  %v1055_v51 = vand.u32 4294901760, %v63_v42  ;;  %v1058_v52 = vsub.f32 %v65_v26, %v1026_v34  ;;  %v1062_v53 = vand.u32 4294901760, %v62_v47 }
  0x1a   :  { %250 = vmatpush.msra.mxu2 %v991_v18  ;;  %302 = vmatpush.msra.mxu3 %v973_v10  ;;  %v166_v55 = vand.u32 4294901760, %v165_v41  ;;  %v177_v56 = vsub.f32 %v1010_v29, %v1488_v45  ;;  %v1486_v57 = vand.u32 4294901760, %v1046_v46  ;;  %v1070_v58 = vsub.f32 %v64_v36, %v1042_v44  ;;  %v87_v41 = vld [vmem:[#allocation2 + $0xe0] sm:$0xff] }
  0x1b   :  { %108 = vmatpush.msra.mxu0 %v975_v11  ;;  %149 = vmatpush.msra.mxu1 %v148_v38  ;;  %v183_v60 = vsub.f32 %v1029_v35, %v1487_v48  ;;  %v172_v62 = vand.u32 4294901760, %v171_v50  ;;  %v1078_v63 = vand.u32 4294901760, %v61_v54  ;;  %v1485_v0 = vand.u32 4294901760, %v1058_v52  ;;  %v83_v45 = vld [vmem:[#allocation2 + $0xc0] sm:$0xff] }
  0x1c   :  { %253 = vmatpush.msra.mxu2 %v994_v19  ;;  %304 = vmatpush.msra.mxu3 %v975_v11  ;;  %v1082_v1 = vsub.f32 %v63_v42, %v1055_v51  ;;  %v1087_v6 = vsub.f32 %v62_v47, %v1062_v53  ;;  %v1089_v8 = vand.u32 4294901760, %v90_v59  ;;  %v178_v12 = vand.u32 4294901760, %v177_v56 }
  0x1d   :  { %110 = vmatpush.msra.mxu0 %v988_v17  ;;  %155 = vmatpush.msra.mxu1 %v154_v43  ;;  %v189_v13 = vsub.f32 %v1046_v46, %v1486_v57  ;;  %v1095_v21 = vand.u32 4294901760, %v60_v61  ;;  %v1483_v26 = vand.u32 4294901760, %v1070_v58  ;;  %v184_v30 = vand.u32 4294901760, %v183_v60  ;;  %v84_v57 = vld [vmem:[#allocation2 + $0xc8] sm:$0xff] }
  0x1e   :  { %256 = vmatpush.msra.mxu2 %v1004_v25  ;;  %306 = vmatpush.msra.mxu3 %v988_v17  ;;  %1502 = vst [vmem:[#allocation12_spill] sm:$0xff] %v1089_v8  ;;  %v1100_v31 = vand.u32 4294901760, %v89_v2  ;;  %v195_v36 = vsub.f32 %v1058_v52, %v1485_v0  ;;  %v1106_v37 = vand.u32 4294901760, %v59_v7  ;;  %v1482_v38 = vand.u32 4294901760, %v1082_v1 }
  0x1f   :  { %112 = vmatpush.msra.mxu0 %v996_v20  ;;  %161 = vmatpush.msra.mxu1 %v160_v49  ;;  %v1110_v39 = vsub.f32 %v61_v54, %v1078_v63  ;;  %v1484_v42 = vand.u32 4294901760, %v1087_v6  ;;  %v1116_v43 = vsub.f32 %v90_v59, %v1089_v8  ;;  %v190_v47 = vand.u32 4294901760, %v189_v13  ;;  %v86_v59 = vld [vmem:[#allocation2 + $0xd8] sm:$0xff] }
  0x20   :  { %259 = vmatpush.msra.mxu2 %v1010_v29  ;;  %308 = vmatpush.msra.mxu3 %v996_v20  ;;  %1503 = vst [vmem:[#allocation13_spill] sm:$0xff] %v1106_v37  ;;  %v201_v49 = vsub.f32 %v1070_v58, %v1483_v26  ;;  %v1123_v50 = vsub.f32 %v60_v61, %v1095_v21  ;;  %v1125_v54 = vand.u32 4294901760, %v88_v32  ;;  %v1132_v56 = vand.u32 4294901760, %v87_v41 }
  0x21   :  { %114 = vmatpush.msra.mxu0 %v1023_v33  ;;  %167 = vmatpush.msra.mxu1 %v166_v55  ;;  %v1130_v55 = vsub.f32 %v89_v2, %v1100_v31  ;;  %v196_v60 = vand.u32 4294901760, %v195_v36  ;;  %v207_v61 = vsub.f32 %v1082_v1, %v1482_v38  ;;  %v213_v2 = vsub.f32 %v1087_v6, %v1484_v42 }
  0x22   :  { %262 = vmatpush.msra.mxu2 %v1029_v35  ;;  %310 = vmatpush.msra.mxu3 %v1023_v33  ;;  %v1492_v13 = vand.u32 4294901760, %v1116_v43  ;;  %v202_v36 = vand.u32 4294901760, %v201_v49  ;;  %v1494_v38 = vand.u32 4294901760, %v1123_v50  ;;  %v1153_v26 = vand.u32 4294901760, %v86_v59 }
  0x23   :  { %116 = vmatpush.msra.mxu0 %v1026_v34  ;;  %173 = vmatpush.msra.mxu1 %v172_v62  ;;  %v1490_v62 = vand.u32 4294901760, %v1110_v39  ;;  %v1496_v42 = vand.u32 4294901760, %v1130_v55  ;;  %v1159_v0 = vsub.f32 %v87_v41, %v1132_v56  ;;  %v214_v40 = vand.u32 4294901760, %v213_v2  ;;  %v82_v2 = vld [vmem:[#allocation2 + $0xb8] sm:$0xff] }
  0x24   :  { %265 = vmatpush.msra.mxu2 %v1046_v46  ;;  %312 = vmatpush.msra.mxu3 %v1026_v34  ;;  %v482_v41 = vsub.f32 %v1116_v43, %v1492_v13  ;;  %v1181_v28 = vand.u32 4294901760, %v84_v57  ;;  %v1189_v27 = vand.u32 4294901760, %v83_v45  ;;  %v1201_v13 = vand.u32 4294901760, %v82_v2 }
  0x25   :  { %118 = vmatpush.msra.mxu0 %v1042_v44  ;;  %179 = vmatpush.msra.mxu1 %v178_v12  ;;  %v1140_v12 = vsub.f32 %v59_v7, %v1106_v37  ;;  %v1151_v7 = vsub.f32 %v88_v32, %v1125_v54  ;;  %v219_v32 = vsub.f32 %v1110_v39, %v1490_v62  ;;  %v1505_v14 = vand.u32 4294901760, %v982_v15 }
  0x26   :  { %268 = vmatpush.msra.mxu2 %v1058_v52  ;;  %314 = vmatpush.msra.mxu3 %v1042_v44  ;;  %v1179_v62 = vsub.f32 %v86_v59, %v1153_v26  ;;  %v1507_v15 = vand.u32 4294901760, %v986_v16  ;;  %v1509_v16 = vand.u32 4294901760, %v991_v18 }
  0x27   :  { %120 = vmatpush.msra.mxu0 %v1055_v51  ;;  %185 = vmatpush.msra.mxu1 %v184_v30  ;;  %v85_v30 = vld [vmem:[#allocation2 + $0xd0] sm:$0xff]  ;;  %v1498_v49 = vand.u32 4294901760, %v1140_v12  ;;  %v220_v59 = vand.u32 4294901760, %v219_v32 }
  0x28   :  { %271 = vmatpush.msra.mxu2 %v1070_v58  ;;  %316 = vmatpush.msra.mxu3 %v1055_v51  ;;  %v1166_v48 = vand.u32 4294901760, %v85_v30 }
  0x29   :  { %122 = vmatpush.msra.mxu0 %v1062_v53  ;;  %191 = vmatpush.msra.mxu1 %v190_v47  ;;  %v208_v47 = vand.u32 4294901760, %v207_v61 }
  0x2a   :  { %274 = vmatpush.msra.mxu2 %v1082_v1  ;;  %318 = vmatpush.msra.mxu3 %v1062_v53  ;;  %v1196_v24 = vsub.f32 %v85_v30, %v1166_v48  ;;  %v1222_v30 = vand.u32 4294901760, %v81_v23 }
  0x2b   :  { %124 = vmatpush.msra.mxu0 %v1078_v63  ;;  %197 = vmatpush.msra.mxu1 %v196_v60  ;;  %v225_v60 = vsub.f32 %v1123_v50, %v1494_v38  ;;  %v231_v38 = vsub.f32 %v1140_v12, %v1498_v49  ;;  %v1209_v49 = vsub.f32 %v84_v57, %v1181_v28 }
  0x2c   :  { %277 = vmatpush.msra.mxu2 %v1087_v6  ;;  %320 = vmatpush.msra.mxu3 %v1078_v63 }
  0x2d   :  { %126 = vmatpush.msra.mxu0 %v1095_v21  ;;  %203 = vmatpush.msra.mxu1 %v202_v36  ;;  %v488_v36 = vsub.f32 %v1130_v55, %v1496_v42  ;;  %v483_v42 = vand.u32 4294901760, %v482_v41  ;;  %v226_v61 = vand.u32 4294901760, %v225_v60  ;;  %v1218_v60 = vsub.f32 %v83_v45, %v1189_v27 }
  0x2e   :  { %280 = vmatpush.msra.mxu2 %v1110_v39  ;;  %322 = vmatpush.msra.mxu3 %v1095_v21 }
  0x2f   :  { %128 = vmatpush.msra.mxu0 %v1106_v37  ;;  %209 = vmatpush.msra.mxu1 %v208_v47  ;;  %v1504_v47 = vand.u32 4294901760, %v1151_v7 }
  0x30   :  { %283 = vmatpush.msra.mxu2 %v1123_v50  ;;  %324 = vmatpush.msra.mxu3 %v1106_v37  ;;  %v80_v37 = vld [vmem:[#allocation2 + $0xa8] sm:$0xff] }
  0x31   :  { %335 = vmatpush.msrb.mxu0 %v140_v22  ;;  %215 = vmatpush.msra.mxu1 %v214_v40  ;;  %v494_v32 = vsub.f32 %v1151_v7, %v1504_v47  ;;  %v489_v22 = vand.u32 4294901760, %v488_v36  ;;  %v1506_v40 = vand.u32 4294901760, %v1159_v0  ;;  %v232_v47 = vand.u32 4294901760, %v231_v38 }
  0x32   :  { %286 = vmatpush.msra.mxu2 %v1140_v12  ;;  %484 = vmatpush.msrb.mxu3 %v483_v42  ;;  %v1227_v36 = vsub.f32 %v82_v2, %v1201_v13  ;;  %v1508_v38 = vand.u32 4294901760, %v1179_v62 }
  0x33   :  { %339 = vmatpush.msrb.mxu0 %v1505_v14  ;;  %v500_v41 = vsub.f32 %v1159_v0, %v1506_v40  ;;  %221 = vmatpush.msra.mxu1 %v220_v59  ;;  %v79_v14 = vld [vmem:[#allocation2 + $0xa0] sm:$0xff]  ;;  %v495_v45 = vand.u32 4294901760, %v494_v32 }
  0x34   :  { %439 = vmatpush.msrb.mxu2 %v1089_v8  ;;  %v1229_v40 = vld [vmem:[#allocation7] sm:$0x3]  ;;  %v506_v59 = vsub.f32 %v1179_v62, %v1508_v38  ;;  %v1236_v8 = vand.u32 4294901760, %v80_v37  ;;  %490 = vmatpush.msrb.mxu3 %v489_v22  ;;  %v1246_v38 = vsub.f32 %v81_v23, %v1222_v30  ;;  %v1248_v57 = vand.u32 4294901760, %v79_v14 }
  0x35   :  { %343 = vmatpush.msrb.mxu0 %v1507_v15  ;;  %227 = vmatpush.msra.mxu1 %v226_v61  ;;  %v501_v42 = vand.u32 4294901760, %v500_v41  ;;  %v78_v15 = vld [vmem:[#allocation2 + $0x98] sm:$0xff]  ;;  %v1510_v61 = vand.u32 4294901760, %v1196_v24  ;;  %v93_v18 = vperm.slane %v1229_v40, 0  ;;  %v1511_v22 = vand.u32 4294901760, %v994_v19 }
  0x36   :  { %441 = vmatpush.msrb.mxu2 %v1100_v31  ;;  %496 = vmatpush.msrb.mxu3 %v495_v45  ;;  %v1262_v2 = vand.u32 4294901760, %v78_v15  ;;  %v1513_v19 = vand.u32 4294901760, %v1004_v25  ;;  %v77_v45 = vld [vmem:[#allocation2 + $0x90] sm:$0xff]  ;;  %v1515_v25 = vand.u32 4294901760, %v1010_v29  ;;  %v1517_v29 = vand.u32 4294901760, %v1029_v35 }
  0x37   :  { %347 = vmatpush.msrb.mxu0 %v1509_v16  ;;  %233 = vmatpush.msra.mxu1 %v232_v47  ;;  %v512_v32 = vsub.f32 %v1196_v24, %v1510_v61  ;;  %v507_v47 = vand.u32 4294901760, %v506_v59  ;;  %v1512_v16 = vand.u32 4294901760, %v1209_v49  ;;  %v1260_v61 = vsub.f32 %v80_v37, %v1236_v8 }
  0x38   :  { %443 = vmatpush.msrb.mxu2 %v1125_v54  ;;  %502 = vmatpush.msrb.mxu3 %v501_v42  ;;  %v1273_v37 = vsub.f32 %v79_v14, %v1248_v57  ;;  %v1275_v41 = vand.u32 4294901760, %v93_v18  ;;  %v1285_v14 = vand.u32 4294901760, %v77_v45  ;;  %v1519_v35 = vand.u32 4294901760, %v1046_v46 }
  0x39   :  { %351 = vmatpush.msrb.mxu0 %v1511_v22  ;;  %402 = vmatpush.msrb.mxu1 %v965_v3  ;;  %v518_v23 = vsub.f32 %v1209_v49, %v1512_v16  ;;  %v1514_v3 = vand.u32 4294901760, %v1218_v60  ;;  %v513_v59 = vand.u32 4294901760, %v512_v32  ;;  %v1288_v16 = vsub.f32 %v78_v15, %v1262_v2 }
  0x3a   :  { %445 = vmatpush.msrb.mxu2 %v1132_v56  ;;  %508 = vmatpush.msrb.mxu3 %v507_v47  ;;  %v1518_v47 = vand.u32 4294901760, %v1246_v38  ;;  %v1299_v32 = vsub.f32 %v93_v18, %v1275_v41  ;;  %v1312_v18 = vsub.f32 %v77_v45, %v1285_v14  ;;  %v1521_v46 = vand.u32 4294901760, %v1058_v52 }
  0x3b   :  { %355 = vmatpush.msrb.mxu0 %v1513_v19  ;;  %404 = vmatpush.msrb.mxu1 %v967_v4  ;;  %v524_v22 = vsub.f32 %v1218_v60, %v1514_v3  ;;  %v1516_v4 = vand.u32 4294901760, %v1227_v36  ;;  %v76_v3 = vld [vmem:[#allocation2 + $0x88] sm:$0xff]  ;;  %v519_v42 = vand.u32 4294901760, %v518_v23 }
  0x3c   :  { %447 = vmatpush.msrb.mxu2 %v1153_v26  ;;  %514 = vmatpush.msrb.mxu3 %v513_v59  ;;  %v536_v23 = vsub.f32 %v1246_v38, %v1518_v47  ;;  %v1301_v15 = vand.u32 4294901760, %v76_v3 }
  0x3d   :  { %359 = vmatpush.msrb.mxu0 %v1515_v25  ;;  %406 = vmatpush.msrb.mxu1 %v969_v5  ;;  %v530_v19 = vsub.f32 %v1227_v36, %v1516_v4  ;;  %v525_v5 = vand.u32 4294901760, %v524_v22  ;;  %v75_v25 = vld [vmem:[#allocation2 + $0x80] sm:$0xff]  ;;  %v547_v4 = vand.u32 4294901760, %v1273_v37  ;;  %v1520_v22 = vand.u32 4294901760, %v1260_v61 }
  0x3e   :  { %449 = vmatpush.msrb.mxu2 %v1166_v48  ;;  %520 = vmatpush.msrb.mxu3 %v519_v42  ;;  %v1314_v47 = vand.u32 4294901760, %v75_v25  ;;  %v131_v42 = vand.u32 4294901760, %v1299_v32  ;;  %v1325_v45 = vsub.f32 %v76_v3, %v1301_v15 }
  0x3f   :  { %363 = vmatpush.msrb.mxu0 %v1517_v29  ;;  %408 = vmatpush.msrb.mxu1 %v971_v9  ;;  %v531_v9 = vand.u32 4294901760, %v530_v19  ;;  %v542_v59 = vsub.f32 %v1260_v61, %v1520_v22  ;;  %v553_v29 = vand.u32 4294901760, %v1288_v16  ;;  %v548_v19 = vsub.f32 %v1273_v37, %v547_v4 }
  0x40   :  { %451 = vmatpush.msrb.mxu2 %v1181_v28  ;;  %526 = vmatpush.msrb.mxu3 %v525_v5  ;;  %v1337_v3 = vsub.f32 %v75_v25, %v1314_v47  ;;  %v1524_v22 = vand.u32 4294901760, %v1087_v6 }
  0x41   :  { %367 = vmatpush.msrb.mxu0 %v1519_v35  ;;  %410 = vmatpush.msrb.mxu1 %v973_v10  ;;  %v537_v10 = vand.u32 4294901760, %v536_v23  ;;  %v1522_v35 = vand.u32 4294901760, %v1070_v58  ;;  %v543_v52 = vand.u32 4294901760, %v542_v59  ;;  %v554_v5 = vsub.f32 %v1288_v16, %v553_v29 }
  0x42   :  { %453 = vmatpush.msrb.mxu2 %v1189_v27  ;;  %532 = vmatpush.msrb.mxu3 %v531_v9  ;;  %v559_v23 = vand.u32 4294901760, %v1312_v18  ;;  %v1523_v58 = vand.u32 4294901760, %v1082_v1  ;;  %v565_v9 = vand.u32 4294901760, %v1325_v45  ;;  %v571_v59 = vand.u32 4294901760, %v1337_v3 }
  0x43   :  { %371 = vmatpush.msrb.mxu0 %v1521_v46  ;;  %412 = vmatpush.msrb.mxu1 %v975_v11  ;;  %v94_v11 = vperm.slane %v1229_v40, 1  ;;  %v132_v40 = vsub.f32 %v1299_v32, %v131_v42  ;;  %v555_v1 = vand.u32 4294901760, %v554_v5  ;;  %v1525_v46 = vand.u32 4294901760, %v1110_v39 }
  0x44   :  { %455 = vmatpush.msrb.mxu2 %v1201_v13  ;;  %538 = vmatpush.msrb.mxu3 %v537_v10  ;;  %v566_v6 = vsub.f32 %v1325_v45, %v565_v9  ;;  %v1526_v10 = vand.u32 4294901760, %v1123_v50 }
  0x45   :  { %375 = vmatpush.msrb.mxu0 %v1522_v35  ;;  %414 = vmatpush.msrb.mxu1 %v988_v17  ;;  %v549_v17 = vand.u32 4294901760, %v548_v19  ;;  %v1349_v25 = vand.u32 4294901760, %v94_v11  ;;  %v1527_v35 = vand.u32 4294901760, %v1140_v12  ;;  %v1530_v12 = vld [vmem:[#allocation12_spill] sm:$0xff] }
  0x46   :  { %457 = vmatpush.msrb.mxu2 %v1222_v30  ;;  %544 = vmatpush.msrb.mxu3 %v543_v52 }
  0x47   :  { %379 = vmatpush.msrb.mxu0 %v1523_v58  ;;  %416 = vmatpush.msrb.mxu1 %v996_v20  ;;  %v560_v20 = vsub.f32 %v1312_v18, %v559_v23  ;;  %v1370_v19 = vsub.f32 %v94_v11, %v1349_v25 }
  0x48   :  { %459 = vmatpush.msrb.mxu2 %v1236_v8  ;;  %550 = vmatpush.msrb.mxu3 %v549_v17 }
  0x49   :  { %383 = vmatpush.msrb.mxu0 %v1524_v22  ;;  %418 = vmatpush.msrb.mxu1 %v1023_v33  ;;  %v133_v33 = vand.u32 4294901760, %v132_v40  ;;  %v561_v39 = vand.u32 4294901760, %v560_v20  ;;  %v472_v11 = vand.u32 4294901760, %v1370_v19 }
  0x4a   :  { %461 = vmatpush.msrb.mxu2 %v1248_v57  ;;  %556 = vmatpush.msrb.mxu3 %v555_v1 }
  0x4b   :  { %387 = vmatpush.msrb.mxu0 %v1525_v46  ;;  %420 = vmatpush.msrb.mxu1 %v1026_v34  ;;  %v572_v34 = vsub.f32 %v1337_v3, %v571_v59 }
  0x4c   :  { %463 = vmatpush.msrb.mxu2 %v1262_v2  ;;  %134 = vmatmul.f32.vlgmr.msra.gmra.mxu0 %v133_v33 }
  0x4d   :  { %391 = vmatpush.msrb.mxu0 %v1526_v10  ;;  %422 = vmatpush.msrb.mxu1 %v1042_v44  ;;  %v567_v44 = vand.u32 4294901760, %v566_v6  ;;  %v573_v50 = vand.u32 4294901760, %v572_v34 }
  0x4e   :  { %465 = vmatpush.msrb.mxu2 %v1285_v14  ;;  %562 = vmatpush.msrb.mxu3 %v561_v39 }
  0x4f   :  { %395 = vmatpush.msrb.mxu0 %v1527_v35  ;;  %424 = vmatpush.msrb.mxu1 %v1055_v51  ;;  %v1528_v51 = vand.u32 4294901760, %v1116_v43 }
  0x50   :  { %467 = vmatpush.msrb.mxu2 %v1301_v15  ;;  %568 = vmatpush.msrb.mxu3 %v567_v44 }
  0x51   :  { %582 = vmatpush.msra.mxu0 %v1116_v43  ;;  %426 = vmatpush.msrb.mxu1 %v1062_v53  ;;  %v473_v53 = vsub.f32 %v1370_v19, %v472_v11 }
  0x52   :  { %469 = vmatpush.msrb.mxu2 %v1314_v47  ;;  %574 = vmatpush.msrb.mxu3 %v573_v50 }
  0x53   :  { %585 = vmatpush.msra.mxu0 %v1130_v55  ;;  %428 = vmatpush.msrb.mxu1 %v1078_v63  ;;  %v1529_v63 = vand.u32 4294901760, %v1130_v55  ;;  %v474_v43 = vand.u32 4294901760, %v473_v53  ;;  %v1533_v55 = vand.u32 4294901760, %v1159_v0 }
  0x54   :  { %289 = vmatmul.f32.vlgmr.msra.gmra.mxu2 %v1299_v32  ;;  %328 = vmatmul.f32.vlgmr.msra.gmra.mxu3 %v131_v42  ;;  %v1531_v32 = vld [vmem:[#allocation13_spill] sm:$0xff] }
  0x55   :  { %588 = vmatpush.msra.mxu0 %v1151_v7  ;;  %676 = vmatpush.msra.mxu2 %v1528_v51 }
  0x56   :  { %430 = vmatpush.msrb.mxu1 %v1095_v21  ;;  %743 = vmatpush.msra.mxu3 %v1530_v12  ;;  %v1532_v21 = vand.u32 4294901760, %v1151_v7  ;;  %v1534_v7 = vand.u32 4294901760, %v1179_v62 }
  0x57   :  { %591 = vmatpush.msra.mxu0 %v1159_v0  ;;  %680 = vmatpush.msra.mxu2 %v1529_v63  ;;  %v1535_v0 = vand.u32 4294901760, %v1196_v24 }
  0x58   :  { %432 = vmatpush.msrb.mxu1 %v1531_v32  ;;  %745 = vmatpush.msra.mxu3 %v1100_v31 }
  0x59   :  { %594 = vmatpush.msra.mxu0 %v1179_v62  ;;  %235 = vmatmul.f32.vlgmr.msra.gmra.mxu1 %v1275_v41 }
  0x5a   :  { %684 = vmatpush.msra.mxu2 %v1532_v21  ;;  %635 = vmatpush.msra.mxu1 %v1530_v12 }
  0x5b   :  { %597 = vmatpush.msra.mxu0 %v1196_v24  ;;  %747 = vmatpush.msra.mxu3 %v1125_v54  ;;  %v1537_v24 = vand.u32 4294901760, %v1218_v60 }
  0x5c   :  { %688 = vmatpush.msra.mxu2 %v1533_v55  ;;  %637 = vmatpush.msra.mxu1 %v1100_v31  ;;  %v1536_v31 = vand.u32 4294901760, %v1209_v49 }
  0x5d   :  { %475 = vmatmul.f32.vlgmr.msrb.gmra.mxu2 %v474_v43  ;;  %600 = vmatpush.msra.mxu0 %v1209_v49 }
  0x5e   :  { %639 = vmatpush.msra.mxu1 %v1125_v54  ;;  %692 = vmatpush.msra.mxu2 %v1534_v7 }
  0x5f   :  { %749 = vmatpush.msra.mxu3 %v1132_v56  ;;  %397 = vmatmul.f32.vlgmr.msrb.gmra.mxu0 %v1275_v41 }
  0x60   :  { %576 = vmatmul.f32.vlgmr.msrb.gmra.mxu3 %v1349_v25  ;;  %603 = vmatpush.msra.mxu0 %v1218_v60 }
  0x61   :  { %641 = vmatpush.msra.mxu1 %v1132_v56  ;;  %696 = vmatpush.msra.mxu2 %v1535_v0 }
  0x62   :  { %751 = vmatpush.msra.mxu3 %v1153_v26  ;;  %434 = vmatmul.f32.vlgmr.msrb.gmra.mxu1 %v1275_v41 }
  0x63   :  { %606 = vmatpush.msra.mxu0 %v1227_v36  ;;  %643 = vmatpush.msra.mxu1 %v1153_v26  ;;  %v1538_v26 = vand.u32 4294901760, %v1227_v36 }
  0x64   :  { %700 = vmatpush.msra.mxu2 %v1536_v31  ;;  %753 = vmatpush.msra.mxu3 %v1166_v48 }
  0x65   :  { %609 = vmatpush.msra.mxu0 %v1246_v38  ;;  %645 = vmatpush.msra.mxu1 %v1166_v48  ;;  %v1539_v48 = vand.u32 4294901760, %v1246_v38 }
  0x66   :  { %704 = vmatpush.msra.mxu2 %v1537_v24  ;;  %755 = vmatpush.msra.mxu3 %v1181_v28 }
  0x67   :  { %612 = vmatpush.msra.mxu0 %v1260_v61  ;;  %647 = vmatpush.msra.mxu1 %v1181_v28  ;;  %v1540_v28 = vand.u32 4294901760, %v1260_v61 }
  0x68   :  { %708 = vmatpush.msra.mxu2 %v1538_v26  ;;  %757 = vmatpush.msra.mxu3 %v1189_v27 }
  0x69   :  { %615 = vmatpush.msra.mxu0 %v1273_v37  ;;  %649 = vmatpush.msra.mxu1 %v1189_v27  ;;  %v91_v27 = vld [vmem:[#allocation5] sm:$0x1] }
  0x6a   :  { %712 = vmatpush.msra.mxu2 %v1539_v48  ;;  %759 = vmatpush.msra.mxu3 %v1201_v13 }
  0x6b   :  { %618 = vmatpush.msra.mxu0 %v1288_v16  ;;  %651 = vmatpush.msra.mxu1 %v1201_v13 }
  0x6c   :  { %716 = vmatpush.msra.mxu2 %v1540_v28  ;;  %761 = vmatpush.msra.mxu3 %v1222_v30 }
  0x6d   :  { %621 = vmatpush.msra.mxu0 %v1312_v18  ;;  %653 = vmatpush.msra.mxu1 %v1222_v30 }
  0x6e   :  { %720 = vmatpush.msra.mxu2 %v547_v4  ;;  %763 = vmatpush.msra.mxu3 %v1236_v8 }
  0x6f   :  { %624 = vmatpush.msra.mxu0 %v1325_v45  ;;  %655 = vmatpush.msra.mxu1 %v1236_v8 }
  0x70   :  { %724 = vmatpush.msra.mxu2 %v553_v29  ;;  %765 = vmatpush.msra.mxu3 %v1248_v57 }
  0x71   :  { %627 = vmatpush.msra.mxu0 %v1337_v3  ;;  %657 = vmatpush.msra.mxu1 %v1248_v57 }
  0x72   :  { %728 = vmatpush.msra.mxu2 %v559_v23  ;;  %767 = vmatpush.msra.mxu3 %v1262_v2 }
  0x73   :  { %630 = vmatmul.f32.vlgmr.msra.gmra.mxu0 %v1370_v19  ;;  %659 = vmatpush.msra.mxu1 %v1262_v2 }
  0x74   :  { %732 = vmatpush.msra.mxu2 %v565_v9  ;;  %769 = vmatpush.msra.mxu3 %v1285_v14 }
  0x75   :  { %661 = vmatpush.msra.mxu1 %v1285_v14 }
  0x76   :  { %736 = vmatpush.msra.mxu2 %v571_v59  ;;  %771 = vmatpush.msra.mxu3 %v1301_v15 }
  0x77   :  { %738 = vmatmul.f32.vlgmr.msra.gmra.mxu2 %v1349_v25  ;;  %663 = vmatpush.msra.mxu1 %v1301_v15 }
  0x78   :  { %773 = vmatpush.msra.mxu3 %v1314_v47 }
  0x79   :  { %775 = vmatmul.f32.vlgmr.msra.gmra.mxu3 %v1349_v25  ;;  %665 = vmatpush.msra.mxu1 %v1314_v47 }
  0x7a   :  { %669 = vmatmul.f32.vlgmr.msra.gmra.mxu1 %v472_v11 }
  0xc9   :  { %v135_v8 = vpop.f32.mrf.mxu0 }
  0xca   :  { %v136_v54 = vadd.f32 %v135_v8, %v91_v27 }
  0xd6   :  { %v236_v56 = vpop.f32.mrf.mxu1 }
  0xd7   :  { %v237_v62 = vadd.f32 %v236_v56, %v136_v54  ;;  %v290_v13 = vpop.f32.mrf.mxu2  ;;  %v329_v30 = vpop.f32.mrf.mxu3 }
  0xd9   :  { %v291_v49 = vadd.f32 %v290_v13, %v237_v62 }
  0xdb   :  { %v330_v60 = vadd.f32 %v329_v30, %v291_v49 }
  0xdc   :  { %v398_v57 = vpop.f32.mrf.mxu0 }
  0xdd   :  { %v399_v36 = vadd.f32 %v398_v57, %v330_v60 }
  0xdf   :  { %v435_v2 = vpop.f32.mrf.mxu1 }
  0xe0   :  { %v436_v38 = vadd.f32 %v435_v2, %v399_v36  ;;  %v476_v41 = vpop.f32.mrf.mxu2 }
  0xe2   :  { %v477_v61 = vadd.f32 %v476_v41, %v436_v38 }
  0xe3   :  { %v577_v16 = vpop.f32.mrf.mxu3 }
  0xe4   :  { %v578_v14 = vadd.f32 %v577_v16, %v477_v61 }
  0xf0   :  { %v631_v37 = vpop.f32.mrf.mxu0 }
  0xf1   :  { %v632_v4 = vadd.f32 %v631_v37, %v578_v14 }
  0xf7   :  { %v670_v15 = vpop.f32.mrf.mxu1 }
  0xf8   :  { %v671_v29 = vadd.f32 %v670_v15, %v632_v4 }
  0xfa   :  { %v739_v18 = vpop.f32.mrf.mxu2 }
  0xfb   :  { %v740_v47 = vadd.f32 %v739_v18, %v671_v29 }
  0xfc   :  { %v776_v42 = vpop.f32.mrf.mxu3 }
  0xfd   :  { %v777_v45 = vadd.f32 %v776_v42, %v740_v47 }
  0xff   :  { %v817_v52 = vmul.f32 -1.442695, %v777_v45 }
 0x101   :  { %824 = vpow2.f32 %v817_v52 }
 0x107   :  { %v825_v5 = vpop.eup %824 }
 0x108   :  { %v782_v23 = vadd.f32 1.0, %v825_v5 }
 0x10a   :  { %826 = vrcp.f32 %v782_v23  ;;  %v794_v40 = vand.u32 2147483648, %v782_v23  ;;  %v792_v22 = vand.u32 2147483647, %v782_v23  ;;  %vm788_vm1 = vweird.f32 %v782_v23 }
 0x10c   :  { %v795_v25 = vor.u32 1.1754944e-38, %v794_v40  ;;  %vm793_vm3 = vcmp.eq.f32.partialorder %v792_v22, 8.507059e+37 }
 0x110   :  { %v827_v3 = vpop.eup %826 }
 0x111   :  { %v784_v58 = vmul.f32 %v827_v3, %v782_v23  ;;  %vm789_vm0 = vweird.f32 %v827_v3 }
 0x112   :  { %vm790_vm2 = vmor %vm788_vm1, %vm789_vm0 }
 0x113   :  { %v785_v17 = vsub.f32 1.0, %v784_v58 }
 0x115   :  { %v786_v9 = vmul.f32 %v827_v3, %v785_v17 }
 0x117   :  { %v787_v1 = vadd.f32 %v827_v3, %v786_v9 }
 0x119   :  { %v791_v20 = vsel %vm790_vm2, %v827_v3, %v787_v1 }
 0x11a   :  { %v796_v59 = vsel %vm793_vm3, %v795_v25, %v791_v20 }
 0x11b   :  { %798 = vst [vmem:[#allocation8] sm:$0x1] %v796_v59 }
 0x11c   :  { %809 = dma.vmem_to_hbm [thread:$0]  %s805_s2, 16, %s807_s30, [#allocation4]  }
 0x11d   :  { %928 = dma.done.wait [#allocation4], 16  }
 0x11e   :  { %929 = vsyncadd [#allocation4], 4294967280 }
 0x11f   :  { %814 = vsyncpa [#allocation3], 1 }
 0x120   :  { %815 = vsyncpa [#allocation6], 1 }
 0x121   :  { %816 = vsyncpa [#allocation4], 1 }

</bundles_post_ra>
